<compile_context>
chip_gen: v5e
topology: v5e:2x2
jax: 0.10.0
libtpu: 0.0.40
codegen_flags: <defaults>
</compile_context>

<pallas_src>
import jax
import jax.numpy as jnp
from jax.experimental import pallas as pl
from jax.experimental.pallas import tpu as pltpu

LANES = 128


def _cdiv(a, b):
    return (a + b - 1) // b


def _round_up(x, m):
    return _cdiv(x, m) * m


def _segmented_weight(w_row, reps):
    """(1, D) weight row -> (reps*D, reps) block-diagonal matrix.

    Column j holds the D weights in rows j*D .. j*D+D-1, so that
    (B/reps, reps*D) @ Wseg reproduces the per-row dot product of the
    original (B, D) layout.
    """
    d = w_row.shape[-1]
    eye = jnp.eye(reps, dtype=jnp.float32)
    return jnp.kron(eye, w_row.reshape(d, 1).astype(jnp.float32))  # (reps*d, reps)


def _qnet_kernel(scal_ref, agg_ref, node_ref, w_ref, o_ref):
    # scal_ref (SMEM, (3,)): [scale_for_agg, scale_for_node, fc_bias]
    s_agg = scal_ref[0]
    s_node = scal_ref[1]
    bias = scal_ref[2]

    # Activations may arrive as bf16 (half the HBM traffic); compute in f32.
    a = jnp.maximum(agg_ref[...].astype(jnp.float32) * s_agg, 0.0)   # (tb4, lane)
    n = jnp.maximum(node_ref[...].astype(jnp.float32) * s_node, 0.0)  # (tb4, lane)

    # Segmented weight-sum on the (otherwise idle) MXU:
    #   w_ref[0] = Wseg_agg, w_ref[1] = Wseg_node, each (lane, reps).
    q = (jnp.dot(a, w_ref[0], preferred_element_type=jnp.float32)
         + jnp.dot(n, w_ref[1], preferred_element_type=jnp.float32))  # (tb4, reps)
    o_ref[...] = q + bias


def qnet_forward(params, node_embed, agg_embed, role="critic",
                 tile_b=8192, min_pallas_batch=512):
    """Pallas implementation of QNet.forward (returns (B, 1) f32 q-values)."""
    B, D = node_embed.shape
    assert agg_embed.shape == (B, D)

    if role == "critic":
        scale_agg, scale_node = params["beta2"], params["beta3"]
    elif role == "actor":
        scale_agg, scale_node = params["theta2"], params["theta3"]
    else:
        raise ValueError(role)

    # Robust to (1,) or scalar-shaped params.
    s_agg = scale_agg.reshape(-1)[0].astype(jnp.float32)
    s_node = scale_node.reshape(-1)[0].astype(jnp.float32)
    bias = params["fc_b"].reshape(-1)[0].astype(jnp.float32)

    # nn.Linear(2D, 1): weight shape (1, 2D); split into the two concat halves.
    fc_w = params["fc_w"].astype(jnp.float32)
    w_agg = fc_w[:, :D]     # weights for the aggregate half
    w_node = fc_w[:, D:]    # weights for the node half

    # Small-batch fast path: pallas_call launch + DMA fixed cost dominates here.
    if B < min_pallas_batch:
        a = jnp.maximum(s_agg * agg_embed.astype(jnp.float32), 0.0)
        n = jnp.maximum(s_node * node_embed.astype(jnp.float32), 0.0)
        return a @ w_agg.T + n @ w_node.T + bias

    # Lane-dense packing factor: D=32 -> pack 4 batch rows per 128-lane row.
    reps = LANES // D if (D <= LANES and LANES % D == 0) else 1
    lane = D * reps

    # Only pad B to a multiple of `reps` (<= reps-1 rows); no tile-multiple pad.
    Bp = _round_up(B, reps)
    if Bp != B:
        pad = Bp - B
        node_embed = jnp.pad(node_embed, ((0, pad), (0, 0)))
        agg_embed = jnp.pad(agg_embed, ((0, pad), (0, 0)))
    B4 = Bp // reps

    # Free row-major reshapes: (Bp, D) -> (Bp/reps, reps*D).
    agg4 = agg_embed.reshape(B4, lane)
    node4 = node_embed.reshape(B4, lane)

    # Resident segmented weights, stacked into a single operand (2, lane, reps).
    wseg = jnp.stack([_segmented_weight(w_agg, reps),
                      _segmented_weight(w_node, reps)])

    scalars = jnp.stack([s_agg, s_node, bias])

    # Batch tile in dense rows.  Default tile_b=8192 original rows -> 2048 dense
    # rows: 2 inputs x 2 buffers x 1 MiB + small output  (fine on every gen).
    tb4 = max(8, _round_up(tile_b, 8 * reps) // reps)
    if tb4 >= B4:
        tb4 = B4
        # v7x has two TensorCores: give the "parallel" axis >= 2 steps when the
        # batch is big enough that each half still amortizes per-step overhead.
        if B4 >= 2048:
            tb4 = _round_up(_cdiv(B4, 2), 8)
    n_steps = _cdiv(B4, tb4)   # partial last block allowed; OOB rows never used

    out4 = pl.pallas_call(
        _qnet_kernel,
        out_shape=jax.ShapeDtypeStruct((B4, reps), jnp.float32),
        grid=(n_steps,),
        in_specs=[
            pl.BlockSpec(memory_space=pltpu.SMEM),               # scalars
            pl.BlockSpec((tb4, lane), lambda i: (i, 0)),         # agg (dense)
            pl.BlockSpec((tb4, lane), lambda i: (i, 0)),         # node (dense)
            pl.BlockSpec((2, lane, reps), lambda i: (0, 0, 0)),  # Wseg (resident)
        ],
        out_specs=pl.BlockSpec((tb4, reps), lambda i: (i, 0)),
        compiler_params=pltpu.CompilerParams(
            dimension_semantics=("parallel",),                   # megacore-shard batch
        ),
    )(scalars, agg4, node4, wseg)

    # (B4, reps) row-major == (Bp, 1); drop the (at most reps-1) padded rows.
    return out4.reshape(Bp, 1)[:B]


def init_qnet_params(key, embed_dim=32):
    """Deterministic parameter init mimicking the PyTorch __init__ shapes."""
    ks = jax.random.split(key, 8)
    lim = 1.0 / jnp.sqrt(jnp.float32(embed_dim * 2))  # nn.Linear default bound
    return {
        "beta1": jax.random.uniform(ks[0], (embed_dim * 2, 1), jnp.float32),   # unused in fwd
        "beta2": jax.random.uniform(ks[1], (1,), jnp.float32),
        "beta3": jax.random.uniform(ks[2], (1,), jnp.float32),
        "theta1": jax.random.uniform(ks[3], (embed_dim * 2, 1), jnp.float32),  # unused in fwd
        "theta2": jax.random.uniform(ks[4], (1,), jnp.float32),
        "theta3": jax.random.uniform(ks[5], (1,), jnp.float32),
        "fc_w": jax.random.uniform(ks[6], (1, embed_dim * 2), jnp.float32, -lim, lim),
        "fc_b": jax.random.uniform(ks[7], (1,), jnp.float32, -lim, lim),
    }


def _reference_forward(params, node_embed, agg_embed, role="critic"):
    if role == "critic":
        s_agg, s_node = params["beta2"], params["beta3"]
    else:
        s_agg, s_node = params["theta2"], params["theta3"]
    combined = jnp.concatenate(
        [s_agg * agg_embed.astype(jnp.float32),
         s_node * node_embed.astype(jnp.float32)], axis=1)
    return jnp.maximum(combined, 0.0) @ params["fc_w"].T + params["fc_b"]


if __name__ == "__main__":
    key = jax.random.PRNGKey(0)
    k_params, k_node, k_agg, k_node2, k_agg2 = jax.random.split(key, 5)

    embed_dim = 32
    params = init_qnet_params(k_params, embed_dim)

    # --- Tiny batch, forced through the Pallas path (kernel correctness) ---
    B0 = 8
    node0 = jax.random.normal(k_node, (B0, embed_dim), jnp.float32)
    agg0 = jax.random.normal(k_agg, (B0, embed_dim), jnp.float32)

    q_critic = qnet_forward(params, node0, agg0, role="critic", min_pallas_batch=0)
    q_actor = qnet_forward(params, node0, agg0, role="actor", min_pallas_batch=0)
    jax.block_until_ready((q_critic, q_actor))

    ref_c = _reference_forward(params, node0, agg0, "critic")
    ref_a = _reference_forward(params, node0, agg0, "actor")
    assert q_critic.shape == (B0, 1) and q_actor.shape == (B0, 1)
    assert jnp.allclose(q_critic, ref_c, atol=1e-5), "critic mismatch"
    assert jnp.allclose(q_actor, ref_a, atol=1e-5), "actor mismatch"

    # --- Small-batch fast path (plain fused XLA) matches too ---
    q_fast = qnet_forward(params, node0, agg0, role="critic")  # default threshold -> jnp path
    assert jnp.allclose(q_fast, ref_c, atol=1e-5), "fast-path mismatch"

    # --- Ragged multi-tile batch, bf16 transport (half the HBM traffic) ---
    # B=999: not a multiple of 4 (exercises the tiny reps-pad) and not a
    # multiple of the tile (exercises the partial last block).
    B1 = 999
    node1 = jax.random.normal(k_node2, (B1, embed_dim), jnp.float32).astype(jnp.bfloat16)
    agg1 = jax.random.normal(k_agg2, (B1, embed_dim), jnp.float32).astype(jnp.bfloat16)
    q1 = qnet_forward(params, node1, agg1, role="critic", tile_b=256)
    jax.block_until_ready(q1)
    ref1 = _reference_forward(params, node1, agg1, "critic")
    assert q1.shape == (B1, 1)
    assert jnp.allclose(q1, ref1, atol=2e-2), "tiled bf16 critic mismatch"

    print("KERNEL_OK")
</pallas_src>

<mosaic_0001>
module attributes {stable_mosaic.version = 11 : i64} {
  func.func @_qnet_kernel(%arg0: i32, %arg1: memref<3xf32, #tpu.memory_space<smem>>, %arg2: memref<2x128xf32, #tpu.memory_space<vmem>>, %arg3: memref<2x128xf32, #tpu.memory_space<vmem>>, %arg4: memref<2x128x4xf32, #tpu.memory_space<vmem>>, %arg5: memref<2x4xf32, #tpu.memory_space<vmem>>) attributes {dimension_semantics = [#tpu.dimension_semantics<parallel>], iteration_bounds = array<i64: 1>, scalar_prefetch = 0 : i64, scratch_operands = 0 : i64, tpu.core_type = #tpu.core_type<tc>, window_params = [{transform_indices = @transform_0, window_bounds = array<i64: 3>}, {transform_indices = @transform_1, window_bounds = array<i64: 2, 128>}, {transform_indices = @transform_2, window_bounds = array<i64: 2, 128>}, {pipeline_mode = #tpu.pipeline_mode<synchronous>, transform_indices = @transform_3, window_bounds = array<i64: 2, 128, 4>}, {transform_indices = @transform_4, window_bounds = array<i64: 2, 4>}]} {
    %c0 = arith.constant 0 : index
    %0 = memref.load %arg1[%c0] : memref<3xf32, #tpu.memory_space<smem>>
    %c1 = arith.constant 1 : index
    %1 = memref.load %arg1[%c1] : memref<3xf32, #tpu.memory_space<smem>>
    %c2 = arith.constant 2 : index
    %2 = memref.load %arg1[%c2] : memref<3xf32, #tpu.memory_space<smem>>
    %c0_0 = arith.constant 0 : index
    %c0_1 = arith.constant 0 : index
    %3 = vector.load %arg2[%c0_0, %c0_1] : memref<2x128xf32, #tpu.memory_space<vmem>>, vector<2x128xf32>
    %4 = vector.broadcast %0 : f32 to vector<2x128xf32>
    %5 = arith.mulf %3, %4 : vector<2x128xf32>
    %cst = arith.constant 0.000000e+00 : f32
    %6 = vector.broadcast %cst : f32 to vector<2x128xf32>
    %7 = arith.maximumf %5, %6 : vector<2x128xf32>
    %c0_2 = arith.constant 0 : index
    %c0_3 = arith.constant 0 : index
    %8 = vector.load %arg3[%c0_2, %c0_3] : memref<2x128xf32, #tpu.memory_space<vmem>>, vector<2x128xf32>
    %9 = vector.broadcast %1 : f32 to vector<2x128xf32>
    %10 = arith.mulf %8, %9 : vector<2x128xf32>
    %cst_4 = arith.constant 0.000000e+00 : f32
    %11 = vector.broadcast %cst_4 : f32 to vector<2x128xf32>
    %12 = arith.maximumf %10, %11 : vector<2x128xf32>
    %c0_5 = arith.constant 0 : index
    %c0_6 = arith.constant 0 : index
    %c0_7 = arith.constant 0 : index
    %13 = vector.load %arg4[%c0_5, %c0_6, %c0_7] : memref<2x128x4xf32, #tpu.memory_space<vmem>>, vector<1x128x4xf32>
    %14 = vector.shape_cast %13 : vector<1x128x4xf32> to vector<128x4xf32>
    %cst_8 = arith.constant dense<0.000000e+00> : vector<2x4xf32>
    %15 = tpu.matmul %7, %14, %cst_8 {dimension_numbers = #tpu.dot_dimension_numbers<[1], [0], [0], [1], [0, 0, 1, 1], [], []>} : vector<2x128xf32>, vector<128x4xf32>, vector<2x4xf32> -> vector<2x4xf32>
    %c1_9 = arith.constant 1 : index
    %c0_10 = arith.constant 0 : index
    %c0_11 = arith.constant 0 : index
    %16 = vector.load %arg4[%c1_9, %c0_10, %c0_11] : memref<2x128x4xf32, #tpu.memory_space<vmem>>, vector<1x128x4xf32>
    %17 = vector.shape_cast %16 : vector<1x128x4xf32> to vector<128x4xf32>
    %cst_12 = arith.constant dense<0.000000e+00> : vector<2x4xf32>
    %18 = tpu.matmul %12, %17, %cst_12 {dimension_numbers = #tpu.dot_dimension_numbers<[1], [0], [0], [1], [0, 0, 1, 1], [], []>} : vector<2x128xf32>, vector<128x4xf32>, vector<2x4xf32> -> vector<2x4xf32>
    %19 = arith.addf %15, %18 : vector<2x4xf32>
    %20 = vector.broadcast %2 : f32 to vector<2x4xf32>
    %21 = arith.addf %19, %20 : vector<2x4xf32>
    %c0_13 = arith.constant 0 : index
    %c0_14 = arith.constant 0 : index
    %22 = vector.load %arg5[%c0_13, %c0_14] : memref<2x4xf32, #tpu.memory_space<vmem>>, vector<2x4xf32>
    tpu.vector_store %arg5[%c0_13, %c0_14], %21 {strides = array<i32>} : memref<2x4xf32, #tpu.memory_space<vmem>>, vector<2x4xf32>,
    return
  }
  func.func @transform_0(%arg0: i32) -> i32 {
    %c0_i32 = arith.constant 0 : i32
    %c0_i32_0 = arith.constant 0 : i32
    return %c0_i32 : i32
  }
  func.func @transform_1(%arg0: i32) -> (i32, i32) {
    %c0_i32 = arith.constant 0 : i32
    %c0_i32_0 = arith.constant 0 : i32
    return %arg0, %c0_i32 : i32, i32
  }
  func.func @transform_2(%arg0: i32) -> (i32, i32) {
    %c0_i32 = arith.constant 0 : i32
    %c0_i32_0 = arith.constant 0 : i32
    return %arg0, %c0_i32 : i32, i32
  }
  func.func @transform_3(%arg0: i32) -> (i32, i32, i32) {
    %c0_i32 = arith.constant 0 : i32
    %c0_i32_0 = arith.constant 0 : i32
    %c0_i32_1 = arith.constant 0 : i32
    %c0_i32_2 = arith.constant 0 : i32
    return %c0_i32, %c0_i32_0, %c0_i32_1 : i32, i32, i32
  }
  func.func @transform_4(%arg0: i32) -> (i32, i32) {
    %c0_i32 = arith.constant 0 : i32
    %c0_i32_0 = arith.constant 0 : i32
    return %arg0, %c0_i32 : i32, i32
  }
}

</mosaic_0001>

<bundles_post_ra>
// kernel: tpu_custom_call.1
= control target key start
LH: loop header
LB: loop body
LE: loop exit
PB: predicated region body
PF: predicated region fallthrough
CT: control target
= control target key end

     0   :  { %9 = vsyncpa [#allocation4], 0  ;;  %s334_s0 = inlined_call_operand.vmem [shape: f32[3], index: 0, kind: input, shape index: {}]   ;;  %s335_s1 = inlined_call_operand.vmem [shape: f32[2,128], index: 1, kind: input, shape index: {}]   ;;  %s336_s2 = inlined_call_operand.vmem [shape: f32[2,128], index: 2, kind: input, shape index: {}]   ;;  %s337_s3 = inlined_call_operand.vmem [shape: f32[2,128,4], index: 3, kind: input, shape index: {}]   ;;  %s338_s4 = inlined_call_operand.hbm [shape: f32[2,4], index: 4, kind: output, shape index: {}]  }
   0x1   :  { %10 = vsyncpa [#allocation3], 0  ;;  %s16_s17 = sshll.u32 %s334_s0, 4  ;;  %s196_s18 = smov [#allocation2]   ;;  %s17_s17 = int_to_ptr.vmem [resolvable:$true] %s16_s17 }
   0x2   :  { %19 = dma.vmem_to_smem %s17_s17, 16, %s196_s18, [#allocation4]  }
   0x3   :  { %192 = dma.done.wait [#allocation4], 16  }
   0x4   :  { %193 = vsyncadd [#allocation4], 4294967280 }
   0x5   :  { %30 = sfence }
   0x6   :  { %v153_v0 = vld [vmem:[%s337_s3 + $0xf8] sm:$0xff]  ;;  %v152_v2 = vld [vmem:[%s337_s3 + $0xf0] sm:$0xff]  ;;  %v151_v4 = vld [vmem:[%s337_s3 + $0xe8] sm:$0xff]  ;;  %s274_s24 = sld [smem:[#allocation2 + $0x1]]  ;;  %s197_s7 = smov [#allocation5]   ;;  %vm117_vm0 = vcmask 25600  }
   0x7   :  { %v57_v1 = vld [vmem:[%s337_s3 + $0x78] sm:$0xff]  ;;  %75 = vmatpush.msra.mxu0 %v153_v0  ;;  %v56_v3 = vld [vmem:[%s337_s3 + $0x70] sm:$0xff]  ;;  %v55_v5 = vld [vmem:[%s337_s3 + $0x68] sm:$0xff]  ;;  %s31_s0 = sld [smem:[#allocation2]]  ;;  %s124_s8 = sshll.u32 %s197_s7, 4  ;;  %s125_s8 = int_to_ptr.vmem [resolvable:$true] %s124_s8 }
   0x8   :  { %95 = vmatpush.msra.mxu1 %v57_v1  ;;  %v150_v6 = vld [vmem:[%s337_s3 + $0xe0] sm:$0xff]  ;;  %v149_v8 = vld [vmem:[%s337_s3 + $0xd8] sm:$0xff]  ;;  %v148_v10 = vld [vmem:[%s337_s3 + $0xd0] sm:$0xff]  ;;  %s137_s6 = sld [smem:[#allocation2 + $0x2]]  ;;  %s126_s11 = sshll.u32 %s338_s4, 4  ;;  %s127_s11 = int_to_ptr.hbm [resolvable:$true] %s126_s11 }
   0x9   :  { %76 = vmatpush.msra.mxu0 %v152_v2  ;;  %v54_v7 = vld [vmem:[%s337_s3 + $0x60] sm:$0xff]  ;;  %v53_v9 = vld [vmem:[%s337_s3 + $0x58] sm:$0xff]  ;;  %v52_v11 = vld [vmem:[%s337_s3 + $0x50] sm:$0xff] }
   0xa   :  { %96 = vmatpush.msra.mxu1 %v56_v3  ;;  %v147_v12 = vld [vmem:[%s337_s3 + $0xc8] sm:$0xff]  ;;  %v146_v14 = vld [vmem:[%s337_s3 + $0xc0] sm:$0xff]  ;;  %v145_v16 = vld [vmem:[%s337_s3 + $0xb8] sm:$0xff] }
   0xb   :  { %77 = vmatpush.msra.mxu0 %v151_v4  ;;  %v51_v13 = vld [vmem:[%s337_s3 + $0x48] sm:$0xff]  ;;  %v50_v15 = vld [vmem:[%s337_s3 + $0x40] sm:$0xff]  ;;  %v49_v17 = vld [vmem:[%s337_s3 + $0x38] sm:$0xff] }
   0xc   :  { %97 = vmatpush.msra.mxu1 %v55_v5  ;;  %v144_v18 = vld [vmem:[%s337_s3 + $0xb0] sm:$0xff]  ;;  %v143_v20 = vld [vmem:[%s337_s3 + $0xa8] sm:$0xff]  ;;  %v142_v22 = vld [vmem:[%s337_s3 + $0xa0] sm:$0xff]  ;;  %v39_v25 = vstv %s274_s24 }
   0xd   :  { %78 = vmatpush.msra.mxu0 %v150_v6  ;;  %v48_v19 = vld [vmem:[%s337_s3 + $0x30] sm:$0xff]  ;;  %v47_v21 = vld [vmem:[%s337_s3 + $0x28] sm:$0xff]  ;;  %v46_v23 = vld [vmem:[%s337_s3 + $0x20] sm:$0xff]  ;;  %v35_v27 = vstv %s31_s0 }
   0xe   :  { %98 = vmatpush.msra.mxu1 %v54_v7  ;;  %v38_v24 = vld [vmem:[%s336_s2] sm:$0x3]  ;;  %v141_v28 = vld [vmem:[%s337_s3 + $0x98] sm:$0xff]  ;;  %v140_v30 = vld [vmem:[%s337_s3 + $0x90] sm:$0xff]  ;;  %v115_v42 = vstv %s137_s6 }
   0xf   :  { %79 = vmatpush.msra.mxu0 %v149_v8  ;;  %v34_v26 = vld [vmem:[%s335_s1] sm:$0x3]  ;;  %v45_v29 = vld [vmem:[%s337_s3 + $0x18] sm:$0xff]  ;;  %v44_v31 = vld [vmem:[%s337_s3 + $0x10] sm:$0xff]  ;;  %v40_v32 = vmul.f32 %v39_v25, %v38_v24 }
  0x10   :  { %99 = vmatpush.msra.mxu1 %v53_v9  ;;  %v36_v33 = vmul.f32 %v35_v27, %v34_v26  ;;  %v139_v34 = vld [vmem:[%s337_s3 + $0x88] sm:$0xff]  ;;  %v138_v36 = vld [vmem:[%s337_s3 + $0x80] sm:$0xff] }
  0x11   :  { %80 = vmatpush.msra.mxu0 %v148_v10  ;;  %v43_v35 = vld [vmem:[%s337_s3 + $0x8] sm:$0xff]  ;;  %v42_v37 = vld [vmem:[%s337_s3] sm:$0xff]  ;;  %v41_v38 = vmax.f32 %v40_v32, 0.0 }
  0x12   :  { %100 = vmatpush.msra.mxu1 %v52_v11  ;;  %v37_v39 = vmax.f32 %v36_v33, 0.0 }
  0x13   :  { %81 = vmatpush.msra.mxu0 %v147_v12 }
  0x14   :  { %101 = vmatpush.msra.mxu1 %v51_v13 }
  0x15   :  { %82 = vmatpush.msra.mxu0 %v146_v14 }
  0x16   :  { %102 = vmatpush.msra.mxu1 %v50_v15 }
  0x17   :  { %83 = vmatpush.msra.mxu0 %v145_v16 }
  0x18   :  { %103 = vmatpush.msra.mxu1 %v49_v17 }
  0x19   :  { %84 = vmatpush.msra.mxu0 %v144_v18 }
  0x1a   :  { %104 = vmatpush.msra.mxu1 %v48_v19 }
  0x1b   :  { %85 = vmatpush.msra.mxu0 %v143_v20 }
  0x1c   :  { %105 = vmatpush.msra.mxu1 %v47_v21 }
  0x1d   :  { %86 = vmatpush.msra.mxu0 %v142_v22 }
  0x1e   :  { %106 = vmatpush.msra.mxu1 %v46_v23 }
  0x1f   :  { %87 = vmatpush.msra.mxu0 %v141_v28 }
  0x20   :  { %107 = vmatpush.msra.mxu1 %v45_v29 }
  0x21   :  { %88 = vmatpush.msra.mxu0 %v140_v30 }
  0x22   :  { %108 = vmatpush.msra.mxu1 %v44_v31 }
  0x23   :  { %89 = vmatpush.msra.mxu0 %v139_v34 }
  0x24   :  { %109 = vmatpush.msra.mxu1 %v43_v35 }
  0x25   :  { %90 = vmatpush.msra.mxu0 %v138_v36 }
  0x26   :  { %110 = vmatpush.msra.mxu1 %v42_v37  ;;  %91 = vmatmul.f32.vlgmr.msra.gmra.mxu0 %v41_v38 }
  0x27   :  { %111 = vmatmul.f32.vlgmr.msra.gmra.mxu1 %v37_v39 }
  0xa3   :  { %v92_v40 = vpop.f32.mrf.mxu0 }
  0xa4   :  { %v112_v41 = vpop.f32.mrf.mxu1 }
  0xa5   :  { %v113_v43 = vadd.f32 %v112_v41, %v92_v40 }
  0xa7   :  { %v116_v44 = vadd.f32 %v115_v42, %v113_v43 }
  0xa9   :  { %118 = vst.msk [vmem:[#allocation5] sm:$0x3] %vm117_vm0, %v116_v44 }
  0xaa   :  { %129 = dma.vmem_to_hbm [thread:$0]  %s125_s8, 32, %s127_s11, [#allocation3]  }
  0xab   :  { %194 = dma.done.wait [#allocation3], 32  }
  0xac   :  { %195 = vsyncadd [#allocation3], 4294967264 }
  0xad   :  { %134 = vsyncpa [#allocation3], 1 }
  0xae   :  { %135 = vsyncpa [#allocation4], 1 }

</bundles_post_ra>
